<compile_context>
chip_gen: v5e
topology: v5e:2x2
jax: 0.10.0
libtpu: 0.0.40
codegen_flags: <defaults>
</compile_context>

<pallas_src>
import functools

import jax
import jax.numpy as jnp
from jax import lax
from jax.experimental import pallas as pl
from jax.experimental.pallas import tpu as pltpu


def _round_up(x, m):
    return ((x + m - 1) // m) * m


# --------------------------------------------------------------------------- matmul
def _matmul_kernel(a_ref, b_ref, o_ref, acc_ref):
    @pl.when(pl.program_id(2) == 0)
    def _():
        acc_ref[...] = jnp.zeros_like(acc_ref)

    acc_ref[...] += jnp.dot(a_ref[...], b_ref[...],
                            preferred_element_type=jnp.float32)

    @pl.when(pl.program_id(2) == pl.num_programs(2) - 1)
    def _():
        o_ref[...] = acc_ref[...].astype(o_ref.dtype)


def matmul(a, b):
    """a @ b (bias-free), zero-padded to MXU-friendly tiles; adaptive tile sizes."""
    M, K = a.shape
    K2, N = b.shape
    assert K == K2
    tm = min(256, _round_up(M, 8))
    tn = min(256, _round_up(N, 128))
    tk = min(512, _round_up(K, 128))
    Mp, Kp, Np = _round_up(M, tm), _round_up(K, tk), _round_up(N, tn)
    a_p = jnp.pad(a, ((0, Mp - M), (0, Kp - K)))
    b_p = jnp.pad(b, ((0, Kp - K), (0, Np - N)))
    out = pl.pallas_call(
        _matmul_kernel,
        out_shape=jax.ShapeDtypeStruct((Mp, Np), jnp.float32),
        grid_spec=pltpu.PrefetchScalarGridSpec(
            num_scalar_prefetch=0,
            grid=(Mp // tm, Np // tn, Kp // tk),
            in_specs=[pl.BlockSpec((tm, tk), lambda i, j, k: (i, k)),
                      pl.BlockSpec((tk, tn), lambda i, j, k: (k, j))],
            out_specs=pl.BlockSpec((tm, tn), lambda i, j, k: (i, j)),
            scratch_shapes=[pltpu.VMEM((tm, tn), jnp.float32)]),
        compiler_params=pltpu.CompilerParams(
            dimension_semantics=("parallel", "parallel", "arbitrary")),
    )(a_p, b_p)
    return out[:M, :N]


# ------------------------------------------------------- fused relative attention core
def _rel_attn_core_kernel(q_ref, k_ref, v_ref, rk_ref, rwb_ref, rrb_ref, o_ref,
                          *, scale):
    Q = q_ref.shape[2]
    K = k_ref.shape[2]
    mlen = K - Q

    q = q_ref[0, 0]              # (Q, D)
    k = k_ref[0, 0]              # (K, D)
    v = v_ref[0, 0]              # (K, D)
    rk = rk_ref[0]               # (K, D)  relative keys (positions klen-1 .. 0)
    rwb = rwb_ref[0, 0]          # (D,)
    rrb = rrb_ref[0, 0]          # (D,)

    nt = (((1,), (1,)), ((), ()))  # contract last dims: a @ b^T
    ac = lax.dot_general(q + rwb, k, nt, preferred_element_type=jnp.float32)   # (Q, K)
    bd = lax.dot_general(q + rrb, rk, nt, preferred_element_type=jnp.float32)  # (Q, K)

    # Relative shift fused in VMEM: BD[i, j] = bd_raw[i, j + (Q-1-i)] for every
    # unmasked position (j <= i + mlen).  Implemented as a log2(Q)-step barrel
    # shifter: each step does one uniform static left-shift (zero fill) and a
    # per-row select on the rows whose shift amount has that bit set.  Positions
    # that fall outside the raw range are exactly the causally masked ones, so
    # end-to-end semantics match torch's pad+reshape _rel_shift.
    row = lax.broadcasted_iota(jnp.int32, (Q, K), 0)
    col = lax.broadcasted_iota(jnp.int32, (Q, K), 1)
    shift_amt = (Q - 1) - row
    for b in range(max(Q - 1, 0).bit_length()):
        t = 1 << b
        shifted = jnp.concatenate(
            [bd[:, t:], jnp.zeros((Q, t), jnp.float32)], axis=1)
        bd = jnp.where(((shift_amt // t) % 2) == 1, shifted, bd)

    score = (ac + bd) * scale
    # Standard Transformer-XL causal-with-memory mask: key j visible iff j <= i + mlen.
    # TODO(synk): an arbitrary user-supplied attn_mask would be an extra (Q, K) input block.
    score = jnp.where(col > row + mlen, -1e30, score)

    m = jnp.max(score, axis=-1, keepdims=True)
    p = jnp.exp(score - m)
    denom = jnp.sum(p, axis=-1, keepdims=True)
    o_ref[0, 0] = jnp.dot(p / denom, v,
                          preferred_element_type=jnp.float32).astype(o_ref.dtype)


def rel_attn_core(q, k, v, r_k, r_w_bias, r_r_bias, *, scale):
    """q: (B,H,Q,D); k, v: (B,H,K,D); r_k: (H,K,D); biases: (H,D) -> (B,H,Q,D)."""
    B, H, Q, D = q.shape
    K = k.shape[2]
    assert K >= Q
    rwb = r_w_bias.reshape(H, 1, D)
    rrb = r_r_bias.reshape(H, 1, D)
    kern = functools.partial(_rel_attn_core_kernel, scale=scale)
    return pl.pallas_call(
        kern,
        out_shape=jax.ShapeDtypeStruct((B, H, Q, D), jnp.float32),
        grid=(B, H),
        in_specs=[
            pl.BlockSpec((1, 1, Q, D), lambda b, h: (b, h, 0, 0)),
            pl.BlockSpec((1, 1, K, D), lambda b, h: (b, h, 0, 0)),
            pl.BlockSpec((1, 1, K, D), lambda b, h: (b, h, 0, 0)),
            pl.BlockSpec((1, K, D), lambda b, h: (h, 0, 0)),
            pl.BlockSpec((1, 1, D), lambda b, h: (h, 0, 0)),
            pl.BlockSpec((1, 1, D), lambda b, h: (h, 0, 0)),
        ],
        out_specs=pl.BlockSpec((1, 1, Q, D), lambda b, h: (b, h, 0, 0)),
        compiler_params=pltpu.CompilerParams(
            dimension_semantics=("parallel", "parallel")),
    )(q, k, v, r_k, rwb, rrb)


# --------------------------------------------------------------- layer norm (+residual)
def _layernorm_kernel(x_ref, g_ref, b_ref, o_ref, *, eps):
    x = x_ref[...]
    mu = jnp.mean(x, axis=-1, keepdims=True)
    xc = x - mu
    var = jnp.mean(xc * xc, axis=-1, keepdims=True)
    o_ref[...] = (xc * lax.rsqrt(var + eps) * g_ref[...] + b_ref[...]).astype(o_ref.dtype)


def _layernorm_residual_kernel(x_ref, res_ref, g_ref, b_ref, o_ref, *, eps):
    x = x_ref[...] + res_ref[...]
    mu = jnp.mean(x, axis=-1, keepdims=True)
    xc = x - mu
    var = jnp.mean(xc * xc, axis=-1, keepdims=True)
    o_ref[...] = (xc * lax.rsqrt(var + eps) * g_ref[...] + b_ref[...]).astype(o_ref.dtype)


def layernorm(x, gamma, beta, *, eps=1e-5):
    """LayerNorm(x) over the last dim.  x: (N, Dm); gamma/beta: (Dm,)."""
    N, Dm = x.shape
    TR = min(512, _round_up(N, 8))
    Np = _round_up(N, TR)
    x_p = jnp.pad(x, ((0, Np - N), (0, 0)))
    out = pl.pallas_call(
        functools.partial(_layernorm_kernel, eps=eps),
        out_shape=jax.ShapeDtypeStruct((Np, Dm), jnp.float32),
        grid=(Np // TR,),
        in_specs=[
            pl.BlockSpec((TR, Dm), lambda i: (i, 0)),
            pl.BlockSpec((1, Dm), lambda i: (0, 0)),   # resident across grid steps
            pl.BlockSpec((1, Dm), lambda i: (0, 0)),
        ],
        out_specs=pl.BlockSpec((TR, Dm), lambda i: (i, 0)),
        compiler_params=pltpu.CompilerParams(dimension_semantics=("parallel",)),
    )(x_p, gamma.reshape(1, Dm), beta.reshape(1, Dm))
    return out[:N]


def layernorm_residual(x, res, gamma, beta, *, eps=1e-5):
    """LayerNorm(x + res) over the last dim.  x, res: (N, Dm); gamma/beta: (Dm,)."""
    N, Dm = x.shape
    TR = min(512, _round_up(N, 8))
    Np = _round_up(N, TR)
    x_p = jnp.pad(x, ((0, Np - N), (0, 0)))
    r_p = jnp.pad(res, ((0, Np - N), (0, 0)))
    out = pl.pallas_call(
        functools.partial(_layernorm_residual_kernel, eps=eps),
        out_shape=jax.ShapeDtypeStruct((Np, Dm), jnp.float32),
        grid=(Np // TR,),
        in_specs=[
            pl.BlockSpec((TR, Dm), lambda i: (i, 0)),
            pl.BlockSpec((TR, Dm), lambda i: (i, 0)),
            pl.BlockSpec((1, Dm), lambda i: (0, 0)),
            pl.BlockSpec((1, Dm), lambda i: (0, 0)),
        ],
        out_specs=pl.BlockSpec((TR, Dm), lambda i: (i, 0)),
        compiler_params=pltpu.CompilerParams(dimension_semantics=("parallel",)),
    )(x_p, r_p, gamma.reshape(1, Dm), beta.reshape(1, Dm))
    return out[:N]


# ------------------------------------------------------------------------ full forward
def rel_multihead_attn_forward(w, r, params, *, n_head, d_head,
                               mems=None, pre_lnorm=False):
    """Relative multi-head attention forward (eval mode, dropout = identity).

    w:    (qlen, bsz, d_model)   current-segment hidden states
    r:    (klen, d_model)        relative positional embeddings (positions klen-1 .. 0)
    mems: (mlen, bsz, d_model)   cached states, or None
    """
    qlen, bsz, d_model = w.shape
    scale = 1.0 / (d_head ** 0.5)

    cat = w if mems is None else jnp.concatenate([mems, w], axis=0)
    klen = cat.shape[0]
    assert r.shape[0] == klen and klen >= qlen

    cat2d = cat.reshape(klen * bsz, d_model)
    if pre_lnorm:
        cat2d = layernorm(cat2d, params["ln_gamma"], params["ln_beta"])

    # qkv_net / r_net projections (bias=False) on the MXU matmul kernel.
    w_heads = matmul(cat2d, params["w_qkv"]).reshape(klen, bsz, 3, n_head, d_head)
    r_head_k = matmul(r, params["w_r"]).reshape(klen, n_head, d_head)

    w_head_q = w_heads[-qlen:, :, 0]          # (qlen, bsz, H, D)
    w_head_k = w_heads[:, :, 1]               # (klen, bsz, H, D)
    w_head_v = w_heads[:, :, 2]

    # (seq, batch, head, d) -> (batch, head, seq, d) layout glue (tiny, XLA-side).
    q_bh = w_head_q.transpose(1, 2, 0, 3)
    k_bh = w_head_k.transpose(1, 2, 0, 3)
    v_bh = w_head_v.transpose(1, 2, 0, 3)
    r_k = r_head_k.transpose(1, 0, 2)         # (H, klen, D)

    attn = rel_attn_core(q_bh, k_bh, v_bh, r_k,
                         params["r_w_bias"], params["r_r_bias"], scale=scale)
    attn_vec = attn.transpose(2, 0, 1, 3).reshape(qlen * bsz, n_head * d_head)

    attn_out = matmul(attn_vec, params["w_o"])                       # (qlen*bsz, d_model)

    w2d = w.reshape(qlen * bsz, d_model)
    if pre_lnorm:
        out2d = w2d + attn_out
    else:
        out2d = layernorm_residual(attn_out, w2d,
                                   params["ln_gamma"], params["ln_beta"])
    return out2d.reshape(qlen, bsz, d_model)


# ------------------------------------------------------------------- pure-JAX reference
def _rel_shift_ref(x):
    # Exact port of RelMultiHeadAttn._rel_shift (zero_triu=False); x: (q, k, b, h).
    q, k = x.shape[0], x.shape[1]
    zero_pad = jnp.zeros((q, 1) + x.shape[2:], x.dtype)
    x_padded = jnp.concatenate([zero_pad, x], axis=1)
    x_padded = x_padded.reshape((k + 1, q) + x.shape[2:])
    return x_padded[1:].reshape(x.shape)


def _reference_forward(w, r, params, *, n_head, d_head, mems=None, pre_lnorm=False):
    HI = lax.Precision.HIGHEST
    qlen, bsz, d_model = w.shape
    scale = 1.0 / (d_head ** 0.5)
    cat = w if mems is None else jnp.concatenate([mems, w], axis=0)
    klen = cat.shape[0]

    def _ln(x):
        mu = jnp.mean(x, axis=-1, keepdims=True)
        var = jnp.mean((x - mu) ** 2, axis=-1, keepdims=True)
        return (x - mu) * lax.rsqrt(var + 1e-5) * params["ln_gamma"] + params["ln_beta"]

    cat_in = _ln(cat) if pre_lnorm else cat
    w_heads = jnp.dot(cat_in, params["w_qkv"], precision=HI)
    r_head_k = jnp.dot(r, params["w_r"], precision=HI).reshape(klen, n_head, d_head)
    w_head_q, w_head_k, w_head_v = jnp.split(w_heads, 3, axis=-1)
    w_head_q = w_head_q[-qlen:].reshape(qlen, bsz, n_head, d_head)
    w_head_k = w_head_k.reshape(klen, bsz, n_head, d_head)
    w_head_v = w_head_v.reshape(klen, bsz, n_head, d_head)

    rw_q = w_head_q + params["r_w_bias"]
    rr_q = w_head_q + params["r_r_bias"]
    AC = jnp.einsum("ibnd,jbnd->ijbn", rw_q, w_head_k, precision=HI)
    BD = _rel_shift_ref(jnp.einsum("ibnd,jnd->ijbn", rr_q, r_head_k, precision=HI))

    attn_score = (AC + BD) * scale
    mlen = klen - qlen
    i = jnp.arange(qlen)[:, None]
    j = jnp.arange(klen)[None, :]
    attn_score = jnp.where((j > i + mlen)[:, :, None, None], -1e30, attn_score)
    attn_prob = jax.nn.softmax(attn_score, axis=1)
    attn_vec = jnp.einsum("ijbn,jbnd->ibnd", attn_prob, w_head_v, precision=HI)
    attn_vec = attn_vec.reshape(qlen, bsz, n_head * d_head)
    attn_out = jnp.dot(attn_vec, params["w_o"], precision=HI)
    if pre_lnorm:
        return w + attn_out
    return _ln(w + attn_out)


if __name__ == "__main__":
    n_head, d_model, d_head = 2, 32, 8
    qlen, mlen, bsz = 8, 8, 2
    klen = qlen + mlen

    key = jax.random.PRNGKey(0)
    ks = jax.random.split(key, 9)
    w = jax.random.normal(ks[0], (qlen, bsz, d_model), jnp.float32) * 0.5
    mems = jax.random.normal(ks[1], (mlen, bsz, d_model), jnp.float32) * 0.5

    # Transformer-XL sinusoidal relative positional embedding for pos_seq = klen-1 .. 0.
    pos_seq = jnp.arange(klen - 1, -1, -1, dtype=jnp.float32)
    inv_freq = 1.0 / (10000.0 ** (jnp.arange(0.0, d_model, 2.0, dtype=jnp.float32) / d_model))
    sin_inp = jnp.outer(pos_seq, inv_freq)
    r = jnp.concatenate([jnp.sin(sin_inp), jnp.cos(sin_inp)], axis=-1)   # (klen, d_model)

    params = {
        "w_qkv": jax.random.normal(ks[2], (d_model, 3 * n_head * d_head), jnp.float32) * 0.1,
        "w_r":   jax.random.normal(ks[3], (d_model, n_head * d_head), jnp.float32) * 0.1,
        "w_o":   jax.random.normal(ks[4], (n_head * d_head, d_model), jnp.float32) * 0.1,
        # TODO(synk): r_net / r_w_bias / r_r_bias live on the RelPartialLearnable subclass
        # (the base-class forward is abstract); they are taken as explicit params here.
        "r_w_bias": jax.random.normal(ks[5], (n_head, d_head), jnp.float32) * 0.1,
        "r_r_bias": jax.random.normal(ks[6], (n_head, d_head), jnp.float32) * 0.1,
        "ln_gamma": 1.0 + 0.1 * jax.random.normal(ks[7], (d_model,), jnp.float32),
        "ln_beta":  0.1 * jax.random.normal(ks[8], (d_model,), jnp.float32),
    }

    for pre_lnorm in (False, True):
        out = rel_multihead_attn_forward(w, r, params, n_head=n_head, d_head=d_head,
                                         mems=mems, pre_lnorm=pre_lnorm)
        out = jax.block_until_ready(out)
        ref = _reference_forward(w, r, params, n_head=n_head, d_head=d_head,
                                 mems=mems, pre_lnorm=pre_lnorm)
        assert out.shape == (qlen, bsz, d_model)
        err = float(jnp.max(jnp.abs(out - ref)))
        assert jnp.allclose(out, ref, atol=1e-4, rtol=1e-4), (
            f"mismatch (pre_lnorm={pre_lnorm}): max abs err {err}")

    print("KERNEL_OK")
</pallas_src>

<mosaic_0001>
module attributes {stable_mosaic.version = 11 : i64} {
  func.func @_matmul_kernel(%arg0: i32, %arg1: i32, %arg2: i32, %arg3: memref<32x128xf32, #tpu.memory_space<vmem>>, %arg4: memref<128x128xf32, #tpu.memory_space<vmem>>, %arg5: memref<32x128xf32, #tpu.memory_space<vmem>>, %arg6: memref<32x128xf32, #tpu.memory_space<vmem>>) attributes {dimension_semantics = [#tpu.dimension_semantics<parallel>, #tpu.dimension_semantics<parallel>, #tpu.dimension_semantics<arbitrary>], iteration_bounds = array<i64: 1, 1, 1>, scalar_prefetch = 0 : i64, scratch_operands = 1 : i64, tpu.core_type = #tpu.core_type<tc>, window_params = [{transform_indices = @transform_0, window_bounds = array<i64: 32, 128>}, {transform_indices = @transform_1, window_bounds = array<i64: 128, 128>}, {transform_indices = @transform_2, window_bounds = array<i64: 32, 128>}]} {
    %c0_i32 = arith.constant 0 : i32
    %0 = arith.cmpi eq, %arg2, %c0_i32 : i32
    %1 = arith.extui %0 : i1 to i32
    %c0_i32_0 = arith.constant 0 : i32
    %2 = arith.cmpi ne, %1, %c0_i32_0 : i32
    scf.if %2 {
      %cst_10 = arith.constant 0.000000e+00 : f32
      %12 = vector.broadcast %cst_10 : f32 to vector<32x128xf32>
      %c0_11 = arith.constant 0 : index
      %c0_12 = arith.constant 0 : index
      %13 = vector.load %arg6[%c0_11, %c0_12] : memref<32x128xf32, #tpu.memory_space<vmem>>, vector<32x128xf32>
      tpu.vector_store %arg6[%c0_11, %c0_12], %12 {strides = array<i32>} : memref<32x128xf32, #tpu.memory_space<vmem>>, vector<32x128xf32>,
    } else {
    }
    %c0 = arith.constant 0 : index
    %c0_1 = arith.constant 0 : index
    %3 = vector.load %arg6[%c0, %c0_1] : memref<32x128xf32, #tpu.memory_space<vmem>>, vector<32x128xf32>
    %c0_2 = arith.constant 0 : index
    %c0_3 = arith.constant 0 : index
    %4 = vector.load %arg3[%c0_2, %c0_3] : memref<32x128xf32, #tpu.memory_space<vmem>>, vector<32x128xf32>
    %c0_4 = arith.constant 0 : index
    %c0_5 = arith.constant 0 : index
    %5 = vector.load %arg4[%c0_4, %c0_5] : memref<128x128xf32, #tpu.memory_space<vmem>>, vector<128x128xf32>
    %cst = arith.constant dense<0.000000e+00> : vector<32x128xf32>
    %6 = tpu.matmul %4, %5, %cst {dimension_numbers = #tpu.dot_dimension_numbers<[1], [0], [0], [1], [0, 0, 1, 1], [], []>} : vector<32x128xf32>, vector<128x128xf32>, vector<32x128xf32> -> vector<32x128xf32>
    %7 = arith.addf %3, %6 : vector<32x128xf32>
    %c0_6 = arith.constant 0 : index
    %c0_7 = arith.constant 0 : index
    %8 = vector.load %arg6[%c0_6, %c0_7] : memref<32x128xf32, #tpu.memory_space<vmem>>, vector<32x128xf32>
    tpu.vector_store %arg6[%c0_6, %c0_7], %7 {strides = array<i32>} : memref<32x128xf32, #tpu.memory_space<vmem>>, vector<32x128xf32>,
    %c0_i32_8 = arith.constant 0 : i32
    %9 = arith.cmpi eq, %arg2, %c0_i32_8 : i32
    %10 = arith.extui %9 : i1 to i32
    %c0_i32_9 = arith.constant 0 : i32
    %11 = arith.cmpi ne, %10, %c0_i32_9 : i32
    scf.if %11 {
      %c0_10 = arith.constant 0 : index
      %c0_11 = arith.constant 0 : index
      %12 = vector.load %arg6[%c0_10, %c0_11] : memref<32x128xf32, #tpu.memory_space<vmem>>, vector<32x128xf32>
      %c0_12 = arith.constant 0 : index
      %c0_13 = arith.constant 0 : index
      %13 = vector.load %arg5[%c0_12, %c0_13] : memref<32x128xf32, #tpu.memory_space<vmem>>, vector<32x128xf32>
      tpu.vector_store %arg5[%c0_12, %c0_13], %12 {strides = array<i32>} : memref<32x128xf32, #tpu.memory_space<vmem>>, vector<32x128xf32>,
    } else {
    }
    return
  }
  func.func @transform_0(%arg0: i32, %arg1: i32, %arg2: i32) -> (i32, i32) {
    %c0_i32 = arith.constant 0 : i32
    return %arg0, %arg2 : i32, i32
  }
  func.func @transform_1(%arg0: i32, %arg1: i32, %arg2: i32) -> (i32, i32) {
    %c0_i32 = arith.constant 0 : i32
    return %arg2, %arg1 : i32, i32
  }
  func.func @transform_2(%arg0: i32, %arg1: i32, %arg2: i32) -> (i32, i32) {
    %c0_i32 = arith.constant 0 : i32
    return %arg0, %arg1 : i32, i32
  }
}

</mosaic_0001>

<bundles_post_ra>
// kernel: tpu_custom_call.1
= control target key start
LH: loop header
LB: loop body
LE: loop exit
PB: predicated region body
PF: predicated region fallthrough
CT: control target
= control target key end

     0   :  { %7 = vsyncpa [#allocation4], 0  ;;  %s313_s0 = inlined_call_operand.hbm [shape: f32[32,128], index: 0, kind: input, shape index: {}]   ;;  %s314_s1 = inlined_call_operand.hbm [shape: f32[128,128], index: 1, kind: input, shape index: {}]   ;;  %s315_s2 = inlined_call_operand.hbm [shape: f32[32,128], index: 2, kind: output, shape index: {}]  }
   0x1   :  { %8 = vsyncpa [#allocation7], 0 }
   0x2   :  { %9 = vsyncpa [#allocation5], 0  ;;  %s14_s11 = sshll.u32 %s313_s0, 4  ;;  %s275_s12 = smov [#allocation3]   ;;  %s15_s11 = int_to_ptr.hbm [resolvable:$true] %s14_s11 }
   0x3   :  { %s16_s13 = sshll.u32 %s275_s12, 4  ;;  %s27_s16 = sshll.u32 %s314_s1, 4  ;;  %s17_s13 = int_to_ptr.vmem [resolvable:$true] %s16_s13  ;;  %s28_s16 = int_to_ptr.hbm [resolvable:$true] %s27_s16 }
   0x4   :  { %s276_s17 = smov 128   ;;  %s277_s18 = smov 8  }
   0x5   :  { %22 = dma.hbm_to_vmem [thread:$0]  %s15_s11, 512, %s17_s13, [#allocation4], %s276_s17, %s276_s17, %s277_s18  }
   0x6   :  { %s278_s19 = smov [#allocation6]  }
   0x7   :  { %s29_s20 = sshll.u32 %s278_s19, 4  ;;  %s30_s20 = int_to_ptr.vmem [resolvable:$true] %s29_s20 }
   0x8   :  { %35 = dma.hbm_to_vmem [thread:$0]  %s28_s16, 2048, %s30_s20, [#allocation7], %s276_s17, %s276_s17, %s277_s18  }
   0x9   :  { %269 = dma.done.wait [#allocation4], 512  }
   0xa   :  { %270 = vsyncadd [#allocation4], 4294966784 }
   0xb   :  { %271 = dma.done.wait [#allocation7], 2048  }
   0xc   :  { %272 = vsyncadd [#allocation7], 4294965248  ;;  %v75_v0 = vld [vmem:[#allocation6 + $0x78] sm:$0xff]  ;;  %v74_v1 = vld [vmem:[#allocation6 + $0x70] sm:$0xff]  ;;  %s279_s0 = smov [#allocation8]   ;;  %s130_s23 = sshll.u32 %s315_s2, 4  ;;  %s131_s23 = int_to_ptr.hbm [resolvable:$true] %s130_s23 }
   0xd   :  { %145 = vmatpush.msra.mxu2 %v75_v0  ;;  %146 = vmatpush.msra.mxu3 %v75_v0  ;;  %v73_v2 = vld [vmem:[#allocation6 + $0x68] sm:$0xff]  ;;  %v72_v3 = vld [vmem:[#allocation6 + $0x60] sm:$0xff]  ;;  %v71_v4 = vld [vmem:[#allocation6 + $0x58] sm:$0xff]  ;;  %s128_s1 = sshll.u32 %s279_s0, 4  ;;  %s129_s1 = int_to_ptr.vmem [resolvable:$true] %s128_s1 }
   0xe   :  { %76 = vmatpush.msra.mxu0 %v75_v0  ;;  %144 = vmatpush.msra.mxu1 %v75_v0  ;;  %v70_v5 = vld [vmem:[#allocation6 + $0x50] sm:$0xff]  ;;  %v69_v6 = vld [vmem:[#allocation6 + $0x48] sm:$0xff]  ;;  %v68_v7 = vld [vmem:[#allocation6 + $0x40] sm:$0xff] }
   0xf   :  { %148 = vmatpush.msra.mxu2 %v74_v1  ;;  %149 = vmatpush.msra.mxu3 %v74_v1  ;;  %v67_v8 = vld [vmem:[#allocation6 + $0x38] sm:$0xff]  ;;  %v66_v9 = vld [vmem:[#allocation6 + $0x30] sm:$0xff]  ;;  %v65_v10 = vld [vmem:[#allocation6 + $0x28] sm:$0xff] }
  0x10   :  { %77 = vmatpush.msra.mxu0 %v74_v1  ;;  %147 = vmatpush.msra.mxu1 %v74_v1  ;;  %v64_v11 = vld [vmem:[#allocation6 + $0x20] sm:$0xff]  ;;  %v63_v12 = vld [vmem:[#allocation6 + $0x18] sm:$0xff]  ;;  %v62_v13 = vld [vmem:[#allocation6 + $0x10] sm:$0xff] }
  0x11   :  { %151 = vmatpush.msra.mxu2 %v73_v2  ;;  %152 = vmatpush.msra.mxu3 %v73_v2  ;;  %v61_v14 = vld [vmem:[#allocation6 + $0x8] sm:$0xff]  ;;  %v60_v15 = vld [vmem:[#allocation6] sm:$0xff]  ;;  %v58_v16 = vld [vmem:[#allocation3 + $0x10] sm:$0xff] }
  0x12   :  { %78 = vmatpush.msra.mxu0 %v73_v2  ;;  %150 = vmatpush.msra.mxu1 %v73_v2  ;;  %v59_v17 = vld [vmem:[#allocation3 + $0x18] sm:$0xff]  ;;  %v56_v18 = vld [vmem:[#allocation3] sm:$0xff]  ;;  %v57_v19 = vld [vmem:[#allocation3 + $0x8] sm:$0xff] }
  0x13   :  { %154 = vmatpush.msra.mxu2 %v72_v3  ;;  %155 = vmatpush.msra.mxu3 %v72_v3 }
  0x14   :  { %79 = vmatpush.msra.mxu0 %v72_v3  ;;  %153 = vmatpush.msra.mxu1 %v72_v3 }
  0x15   :  { %157 = vmatpush.msra.mxu2 %v71_v4  ;;  %158 = vmatpush.msra.mxu3 %v71_v4 }
  0x16   :  { %80 = vmatpush.msra.mxu0 %v71_v4  ;;  %156 = vmatpush.msra.mxu1 %v71_v4 }
  0x17   :  { %160 = vmatpush.msra.mxu2 %v70_v5  ;;  %161 = vmatpush.msra.mxu3 %v70_v5 }
  0x18   :  { %81 = vmatpush.msra.mxu0 %v70_v5  ;;  %159 = vmatpush.msra.mxu1 %v70_v5 }
  0x19   :  { %163 = vmatpush.msra.mxu2 %v69_v6  ;;  %164 = vmatpush.msra.mxu3 %v69_v6 }
  0x1a   :  { %82 = vmatpush.msra.mxu0 %v69_v6  ;;  %162 = vmatpush.msra.mxu1 %v69_v6 }
  0x1b   :  { %166 = vmatpush.msra.mxu2 %v68_v7  ;;  %167 = vmatpush.msra.mxu3 %v68_v7 }
  0x1c   :  { %83 = vmatpush.msra.mxu0 %v68_v7  ;;  %165 = vmatpush.msra.mxu1 %v68_v7 }
  0x1d   :  { %169 = vmatpush.msra.mxu2 %v67_v8  ;;  %170 = vmatpush.msra.mxu3 %v67_v8 }
  0x1e   :  { %84 = vmatpush.msra.mxu0 %v67_v8  ;;  %168 = vmatpush.msra.mxu1 %v67_v8 }
  0x1f   :  { %172 = vmatpush.msra.mxu2 %v66_v9  ;;  %173 = vmatpush.msra.mxu3 %v66_v9 }
  0x20   :  { %85 = vmatpush.msra.mxu0 %v66_v9  ;;  %171 = vmatpush.msra.mxu1 %v66_v9 }
  0x21   :  { %175 = vmatpush.msra.mxu2 %v65_v10  ;;  %176 = vmatpush.msra.mxu3 %v65_v10 }
  0x22   :  { %86 = vmatpush.msra.mxu0 %v65_v10  ;;  %174 = vmatpush.msra.mxu1 %v65_v10 }
  0x23   :  { %178 = vmatpush.msra.mxu2 %v64_v11  ;;  %179 = vmatpush.msra.mxu3 %v64_v11 }
  0x24   :  { %87 = vmatpush.msra.mxu0 %v64_v11  ;;  %177 = vmatpush.msra.mxu1 %v64_v11 }
  0x25   :  { %181 = vmatpush.msra.mxu2 %v63_v12  ;;  %182 = vmatpush.msra.mxu3 %v63_v12 }
  0x26   :  { %88 = vmatpush.msra.mxu0 %v63_v12  ;;  %180 = vmatpush.msra.mxu1 %v63_v12 }
  0x27   :  { %184 = vmatpush.msra.mxu2 %v62_v13  ;;  %185 = vmatpush.msra.mxu3 %v62_v13 }
  0x28   :  { %89 = vmatpush.msra.mxu0 %v62_v13  ;;  %183 = vmatpush.msra.mxu1 %v62_v13 }
  0x29   :  { %187 = vmatpush.msra.mxu2 %v61_v14  ;;  %188 = vmatpush.msra.mxu3 %v61_v14 }
  0x2a   :  { %90 = vmatpush.msra.mxu0 %v61_v14  ;;  %186 = vmatpush.msra.mxu1 %v61_v14 }
  0x2b   :  { %190 = vmatpush.msra.mxu2 %v60_v15  ;;  %191 = vmatpush.msra.mxu3 %v60_v15 }
  0x2c   :  { %98 = vmatmul.f32.vlgmr.msra.gmra.mxu2 %v58_v16  ;;  %101 = vmatmul.f32.vlgmr.msra.gmra.mxu3 %v59_v17 }
  0x2d   :  { %91 = vmatpush.msra.mxu0 %v60_v15  ;;  %189 = vmatpush.msra.mxu1 %v60_v15 }
  0x2e   :  { %92 = vmatmul.f32.vlgmr.msra.gmra.mxu0 %v56_v18  ;;  %95 = vmatmul.f32.vlgmr.msra.gmra.mxu1 %v57_v19 }
  0xab   :  { %v93_v20 = vpop.f32.mrf.mxu0  ;;  %v96_v21 = vpop.f32.mrf.mxu1 }
  0xac   :  { %120 = vst [vmem:[#allocation8] sm:$0xff] %v93_v20 }
  0xad   :  { %121 = vst [vmem:[#allocation8 + $0x8] sm:$0xff] %v96_v21 }
  0xaf   :  { %v99_v22 = vpop.f32.mrf.mxu2  ;;  %v102_v23 = vpop.f32.mrf.mxu3 }
  0xb0   :  { %122 = vst [vmem:[#allocation8 + $0x10] sm:$0xff] %v99_v22 }
  0xb1   :  { %123 = vst [vmem:[#allocation8 + $0x18] sm:$0xff] %v102_v23 }
  0xb2   :  { %136 = dma.vmem_to_hbm [thread:$0]  %s129_s1, 512, %s131_s23, [#allocation5], %s276_s17, %s276_s17, %s277_s18  }
  0xb3   :  { %273 = dma.done.wait [#allocation5], 512  }
  0xb4   :  { %274 = vsyncadd [#allocation5], 4294966784 }
  0xb5   :  { %141 = vsyncpa [#allocation4], 1 }
  0xb6   :  { %142 = vsyncpa [#allocation7], 1 }
  0xb7   :  { %143 = vsyncpa [#allocation5], 1 }

</bundles_post_ra>
